<compile_context>
chip_gen: v7x
topology: tpu7x:2x2x1
jax: 0.10.0
libtpu: 0.0.40
codegen_flags: <defaults>
</compile_context>

<pallas_src>
import jax
import jax.numpy as jnp
from jax.experimental import pallas as pl
from jax.experimental.pallas import tpu as pltpu


def _round_up(a: int, b: int) -> int:
    return ((a + b - 1) // b) * b


def mlp_head_kernel(x_ref, w1_ref, b1_ref, w2_ref, b2_ref, w3_ref, b3_ref, o_ref):
    # Cast the f32 activation tile to bf16 in VMEM (avoids a separate HBM pass).
    x = x_ref[...].astype(jnp.bfloat16)
    # fc1 + ReLU   (dropout == identity in eval mode)
    h1 = jnp.dot(x, w1_ref[...], preferred_element_type=jnp.float32)
    h1 = jnp.maximum(h1 + b1_ref[...], 0.0)
    # fc2 + ReLU   (output dim zero-padded to 128 lanes -> lane-dense h2)
    h2 = jnp.dot(h1.astype(jnp.bfloat16), w2_ref[...],
                 preferred_element_type=jnp.float32)
    h2 = jnp.maximum(h2 + b2_ref[...], 0.0)
    # classifier   (labels zero-padded to 128 lanes -> dense vst stores)
    logits = jnp.dot(h2.astype(jnp.bfloat16), w3_ref[...],
                     preferred_element_type=jnp.float32) + b3_ref[...]
    o_ref[...] = logits.astype(o_ref.dtype)


def mlp_head(x_bsh, w1, b1, w2, b2, w3, b3, *, tm=1024):
    """x_bsh: [B, S, H] hidden states (the BERT last_hidden_state stand-in).

    Weights are [in, out] (transpose of PyTorch [out, in]); biases [out] or [1, out].
    Returns [B, S, num_labels] float32 logits.
    """
    B, S, H = x_bsh.shape
    M = B * S
    d2 = w2.shape[1]
    num_labels = w3.shape[1]

    LANES = 128
    d2_pad = _round_up(d2, LANES)
    n_pad = _round_up(num_labels, LANES)

    # Row tile: multiple of 16 (bf16 sublane packing), >= 2 grid steps when M
    # allows it (v7x has 2 TensorCores), never grossly larger than M.
    tm_cap = max(16, _round_up(pl.cdiv(M, 2), 16))
    tm_eff = max(16, min(_round_up(tm, 16), tm_cap, _round_up(M, 16)))
    grid = (pl.cdiv(M, tm_eff),)

    # x stays f32 in HBM (reshape is layout-only); kernel casts per-tile.
    x2d = x_bsh.reshape(M, H)

    # Tiny one-off weight/bias prep (negligible traffic).
    w1b = w1.astype(jnp.bfloat16)
    b1f = b1.reshape(1, -1).astype(jnp.float32)
    w2b = jnp.pad(w2, ((0, 0), (0, d2_pad - d2))).astype(jnp.bfloat16)
    b2f = jnp.pad(b2.reshape(1, -1).astype(jnp.float32), ((0, 0), (0, d2_pad - d2)))
    w3b = jnp.pad(w3, ((0, d2_pad - d2), (0, n_pad - num_labels))).astype(jnp.bfloat16)
    b3f = jnp.pad(b3.reshape(1, -1).astype(jnp.float32), ((0, 0), (0, n_pad - num_labels)))

    out = pl.pallas_call(
        mlp_head_kernel,
        out_shape=jax.ShapeDtypeStruct((M, n_pad), jnp.bfloat16),
        grid_spec=pltpu.PrefetchScalarGridSpec(
            num_scalar_prefetch=0,
            grid=grid,
            in_specs=[
                pl.BlockSpec((tm_eff, H), lambda i: (i, 0)),   # x rows (streamed)
                pl.BlockSpec(w1b.shape, lambda i: (0, 0)),     # fc1 weight (resident)
                pl.BlockSpec(b1f.shape, lambda i: (0, 0)),     # fc1 bias
                pl.BlockSpec(w2b.shape, lambda i: (0, 0)),     # fc2 weight
                pl.BlockSpec(b2f.shape, lambda i: (0, 0)),     # fc2 bias
                pl.BlockSpec(w3b.shape, lambda i: (0, 0)),     # classifier weight
                pl.BlockSpec(b3f.shape, lambda i: (0, 0)),     # classifier bias
            ],
            out_specs=pl.BlockSpec((tm_eff, n_pad), lambda i: (i, 0)),
        ),
        compiler_params=pltpu.CompilerParams(
            dimension_semantics=("parallel",),
            vmem_limit_bytes=32 << 20,   # fits tm<=2048 @ H=768; v7x-safe
        ),
    )(x2d, w1b, b1f, w2b, b2f, w3b, b3f)

    # Tiny epilogue: strip lane padding, restore f32 logits like the PyTorch head.
    return out[:, :num_labels].astype(jnp.float32).reshape(B, S, num_labels)


if __name__ == "__main__":
    # Small shapes consistent with the forward pass
    # (bert-base would be H=768; kept small here).
    B, S, H = 2, 8, 128
    D1, D2 = 256, 32            # fc1 / fc2 output dims (as in the module)
    NUM_LABELS = 8

    key = jax.random.PRNGKey(0)
    kx, k1, k2, k3, kb1, kb2, kb3 = jax.random.split(key, 7)

    # Deterministic synthetic "last_hidden_state" and parameters.
    x = jax.random.normal(kx, (B, S, H), dtype=jnp.float32)
    w1 = jax.random.normal(k1, (H, D1), dtype=jnp.float32) * 0.02
    b1 = jax.random.normal(kb1, (1, D1), dtype=jnp.float32) * 0.02
    w2 = jax.random.normal(k2, (D1, D2), dtype=jnp.float32) * 0.02
    b2 = jax.random.normal(kb2, (1, D2), dtype=jnp.float32) * 0.02
    w3 = jax.random.normal(k3, (D2, NUM_LABELS), dtype=jnp.float32) * 0.02
    b3 = jax.random.normal(kb3, (1, NUM_LABELS), dtype=jnp.float32) * 0.02

    logits = mlp_head(x, w1, b1, w2, b2, w3, b3)
    logits = jax.block_until_ready(logits)

    # Pure-JAX reference mirroring the kernel's bf16-input / f32-accumulate math
    # and the bf16 logits writeback.
    def bf(a):
        return a.astype(jnp.bfloat16).astype(jnp.float32)

    xf = bf(x.reshape(B * S, H))
    h1 = jnp.maximum(xf @ bf(w1) + b1, 0.0)
    h2 = jnp.maximum(bf(h1) @ bf(w2) + b2, 0.0)
    ref = (bf(h2) @ bf(w3) + b3)
    ref = ref.astype(jnp.bfloat16).astype(jnp.float32).reshape(B, S, NUM_LABELS)

    assert logits.shape == (B, S, NUM_LABELS)
    assert jnp.allclose(logits, ref, atol=1e-3, rtol=1e-2)
    print("KERNEL_OK")
</pallas_src>

<mosaic_0001>
module attributes {stable_mosaic.version = 11 : i64} {
  func.func @mlp_head_kernel(%arg0: i32, %arg1: memref<16x128xf32, #tpu.memory_space<vmem>>, %arg2: memref<128x256xbf16, #tpu.memory_space<vmem>>, %arg3: memref<1x256xf32, #tpu.memory_space<vmem>>, %arg4: memref<256x128xbf16, #tpu.memory_space<vmem>>, %arg5: memref<1x128xf32, #tpu.memory_space<vmem>>, %arg6: memref<128x128xbf16, #tpu.memory_space<vmem>>, %arg7: memref<1x128xf32, #tpu.memory_space<vmem>>, %arg8: memref<16x128xbf16, #tpu.memory_space<vmem>>) attributes {dimension_semantics = [#tpu.dimension_semantics<parallel>], iteration_bounds = array<i64: 1>, scalar_prefetch = 0 : i64, scratch_operands = 0 : i64, tpu.core_type = #tpu.core_type<tc>, window_params = [{transform_indices = @transform_0, window_bounds = array<i64: 16, 128>}, {pipeline_mode = #tpu.pipeline_mode<synchronous>, transform_indices = @transform_1, window_bounds = array<i64: 128, 256>}, {pipeline_mode = #tpu.pipeline_mode<synchronous>, transform_indices = @transform_2, window_bounds = array<i64: 1, 256>}, {pipeline_mode = #tpu.pipeline_mode<synchronous>, transform_indices = @transform_3, window_bounds = array<i64: 256, 128>}, {pipeline_mode = #tpu.pipeline_mode<synchronous>, transform_indices = @transform_4, window_bounds = array<i64: 1, 128>}, {pipeline_mode = #tpu.pipeline_mode<synchronous>, transform_indices = @transform_5, window_bounds = array<i64: 128, 128>}, {pipeline_mode = #tpu.pipeline_mode<synchronous>, transform_indices = @transform_6, window_bounds = array<i64: 1, 128>}, {transform_indices = @transform_7, window_bounds = array<i64: 16, 128>}]} {
    %c0 = arith.constant 0 : index
    %c0_0 = arith.constant 0 : index
    %0 = vector.load %arg1[%c0, %c0_0] : memref<16x128xf32, #tpu.memory_space<vmem>>, vector<16x128xf32>
    %1 = arith.truncf %0 : vector<16x128xf32> to vector<16x128xbf16>
    %c0_1 = arith.constant 0 : index
    %c0_2 = arith.constant 0 : index
    %2 = vector.load %arg2[%c0_1, %c0_2] : memref<128x256xbf16, #tpu.memory_space<vmem>>, vector<128x256xbf16>
    %cst = arith.constant dense<0.000000e+00> : vector<16x256xf32>
    %3 = tpu.matmul %1, %2, %cst {dimension_numbers = #tpu.dot_dimension_numbers<[1], [0], [0], [1], [0, 0, 1, 1], [], []>} : vector<16x128xbf16>, vector<128x256xbf16>, vector<16x256xf32> -> vector<16x256xf32>
    %c0_3 = arith.constant 0 : index
    %c0_4 = arith.constant 0 : index
    %4 = vector.load %arg3[%c0_3, %c0_4] : memref<1x256xf32, #tpu.memory_space<vmem>>, vector<1x256xf32>
    %5 = vector.broadcast %4 : vector<1x256xf32> to vector<16x256xf32>
    %6 = arith.addf %3, %5 : vector<16x256xf32>
    %cst_5 = arith.constant 0.000000e+00 : f32
    %7 = vector.broadcast %cst_5 : f32 to vector<16x256xf32>
    %8 = arith.maximumf %6, %7 : vector<16x256xf32>
    %9 = arith.truncf %8 : vector<16x256xf32> to vector<16x256xbf16>
    %c0_6 = arith.constant 0 : index
    %c0_7 = arith.constant 0 : index
    %10 = vector.load %arg4[%c0_6, %c0_7] : memref<256x128xbf16, #tpu.memory_space<vmem>>, vector<256x128xbf16>
    %cst_8 = arith.constant dense<0.000000e+00> : vector<16x128xf32>
    %11 = tpu.matmul %9, %10, %cst_8 {dimension_numbers = #tpu.dot_dimension_numbers<[1], [0], [0], [1], [0, 0, 1, 1], [], []>} : vector<16x256xbf16>, vector<256x128xbf16>, vector<16x128xf32> -> vector<16x128xf32>
    %c0_9 = arith.constant 0 : index
    %c0_10 = arith.constant 0 : index
    %12 = vector.load %arg5[%c0_9, %c0_10] : memref<1x128xf32, #tpu.memory_space<vmem>>, vector<1x128xf32>
    %13 = vector.broadcast %12 : vector<1x128xf32> to vector<16x128xf32>
    %14 = arith.addf %11, %13 : vector<16x128xf32>
    %cst_11 = arith.constant 0.000000e+00 : f32
    %15 = vector.broadcast %cst_11 : f32 to vector<16x128xf32>
    %16 = arith.maximumf %14, %15 : vector<16x128xf32>
    %17 = arith.truncf %16 : vector<16x128xf32> to vector<16x128xbf16>
    %c0_12 = arith.constant 0 : index
    %c0_13 = arith.constant 0 : index
    %18 = vector.load %arg6[%c0_12, %c0_13] : memref<128x128xbf16, #tpu.memory_space<vmem>>, vector<128x128xbf16>
    %cst_14 = arith.constant dense<0.000000e+00> : vector<16x128xf32>
    %19 = tpu.matmul %17, %18, %cst_14 {dimension_numbers = #tpu.dot_dimension_numbers<[1], [0], [0], [1], [0, 0, 1, 1], [], []>} : vector<16x128xbf16>, vector<128x128xbf16>, vector<16x128xf32> -> vector<16x128xf32>
    %c0_15 = arith.constant 0 : index
    %c0_16 = arith.constant 0 : index
    %20 = vector.load %arg7[%c0_15, %c0_16] : memref<1x128xf32, #tpu.memory_space<vmem>>, vector<1x128xf32>
    %21 = vector.broadcast %20 : vector<1x128xf32> to vector<16x128xf32>
    %22 = arith.addf %19, %21 : vector<16x128xf32>
    %23 = arith.truncf %22 : vector<16x128xf32> to vector<16x128xbf16>
    %c0_17 = arith.constant 0 : index
    %c0_18 = arith.constant 0 : index
    %24 = vector.load %arg8[%c0_17, %c0_18] : memref<16x128xbf16, #tpu.memory_space<vmem>>, vector<16x128xbf16>
    tpu.vector_store %arg8[%c0_17, %c0_18], %23 {strides = array<i32>} : memref<16x128xbf16, #tpu.memory_space<vmem>>, vector<16x128xbf16>,
    return
  }
  func.func @transform_0(%arg0: i32) -> (i32, i32) {
    %c0_i32 = arith.constant 0 : i32
    %c0_i32_0 = arith.constant 0 : i32
    return %arg0, %c0_i32 : i32, i32
  }
  func.func @transform_1(%arg0: i32) -> (i32, i32) {
    %c0_i32 = arith.constant 0 : i32
    %c0_i32_0 = arith.constant 0 : i32
    %c0_i32_1 = arith.constant 0 : i32
    return %c0_i32, %c0_i32_0 : i32, i32
  }
  func.func @transform_2(%arg0: i32) -> (i32, i32) {
    %c0_i32 = arith.constant 0 : i32
    %c0_i32_0 = arith.constant 0 : i32
    %c0_i32_1 = arith.constant 0 : i32
    return %c0_i32, %c0_i32_0 : i32, i32
  }
  func.func @transform_3(%arg0: i32) -> (i32, i32) {
    %c0_i32 = arith.constant 0 : i32
    %c0_i32_0 = arith.constant 0 : i32
    %c0_i32_1 = arith.constant 0 : i32
    return %c0_i32, %c0_i32_0 : i32, i32
  }
  func.func @transform_4(%arg0: i32) -> (i32, i32) {
    %c0_i32 = arith.constant 0 : i32
    %c0_i32_0 = arith.constant 0 : i32
    %c0_i32_1 = arith.constant 0 : i32
    return %c0_i32, %c0_i32_0 : i32, i32
  }
  func.func @transform_5(%arg0: i32) -> (i32, i32) {
    %c0_i32 = arith.constant 0 : i32
    %c0_i32_0 = arith.constant 0 : i32
    %c0_i32_1 = arith.constant 0 : i32
    return %c0_i32, %c0_i32_0 : i32, i32
  }
  func.func @transform_6(%arg0: i32) -> (i32, i32) {
    %c0_i32 = arith.constant 0 : i32
    %c0_i32_0 = arith.constant 0 : i32
    %c0_i32_1 = arith.constant 0 : i32
    return %c0_i32, %c0_i32_0 : i32, i32
  }
  func.func @transform_7(%arg0: i32) -> (i32, i32) {
    %c0_i32 = arith.constant 0 : i32
    %c0_i32_0 = arith.constant 0 : i32
    return %arg0, %c0_i32 : i32, i32
  }
}

</mosaic_0001>

<bundles_post_ra>
// kernel: tpu_custom_call.1
= control target key start
LH: loop header
LB: loop body
LE: loop exit
PB: predicated region body
PF: predicated region fallthrough
CT: control target
= control target key end

     0   :  { %12 = vsyncpa [#allocation3], 0  ;;  %s980_s0 = inlined_call_operand.hbm [shape: f32[16,128], index: 0, kind: input, shape index: {}]   ;;  %s981_s1 = inlined_call_operand.hbm [shape: bf16[128,256], index: 1, kind: input, shape index: {}]   ;;  %s982_s2 = inlined_call_operand.vmem [shape: f32[1,256], index: 2, kind: input, shape index: {}]   ;;  %s983_s3 = inlined_call_operand.hbm [shape: bf16[256,128], index: 3, kind: input, shape index: {}]   ;;  %s984_s4 = inlined_call_operand.vmem [shape: f32[1,128], index: 4, kind: input, shape index: {}]   ;;  %s985_s5 = inlined_call_operand.hbm [shape: bf16[128,128], index: 5, kind: input, shape index: {}]   ;;  %s986_s6 = inlined_call_operand.vmem [shape: f32[1,128], index: 6, kind: input, shape index: {}]   ;;  %s987_s7 = inlined_call_operand.hbm [shape: bf16[16,128], index: 7, kind: output, shape index: {}]  }
   0x1   :  { %13 = vsyncpa [#allocation6], 0 }
   0x2   :  { %14 = vsyncpa [#allocation9], 0 }
   0x3   :  { %15 = vsyncpa [#allocation4], 0  ;;  %s843_s24 = smov [#allocation5]   ;;  %s844_s26 = smov [#allocation2]  }
   0x4   :  { %s33_s25 = sshll.u32 %s843_s24, 4  ;;  %s21_s27 = sshll.u32 %s844_s26, 4  ;;  %s34_s25 = int_to_ptr.vmem [resolvable:$true] %s33_s25  ;;  %s895_s27 = int_to_ptr.vmem [resolvable:$true] %s21_s27 }
   0x5   :  { %s725_s30 = scalar_lea.hbm %s981_s1, 2048 }
   0x6   :  { %p726_p0 = scmp.ne.s32.totalorder %s981_s1, %s725_s30  ;;  %p729_p1 = scmp.lt.u32.totalorder %s725_s30, %s981_s1 }
   0x8   :  { %p731_p2 = pnand %p729_p1, %p726_p0 }
   0xa   :  { %734 = shalt.err (!%p731_p2)
}
   0xb   :  { %s735_s12 = scalar_lea.vmem %s34_s25, 2048  ;;  %p740_p4 = scmp.lt.s32.totalorder %s34_s25, %s34_s25 }
   0xc   :  { %p736_p3 = scmp.ne.s32.totalorder %s34_s25, %s735_s12  ;;  %p741_p5 = scmp.lt.s32.totalorder %s735_s12, %s735_s12 }
   0xe   :  { %p742_p6 = por %p741_p5, %p740_p4 }
  0x10   :  { %p743_p7 = pnand %p742_p6, %p736_p3 }
  0x12   :  { %746 = shalt.err (!%p743_p7)
}
  0x13   :  { %s845_s13 = smov 128   ;;  %s846_s14 = smov 8  }
  0x14   :  { %39 = dma.hbm_to_vmem [thread:$0]  %s981_s1, 2048, %s34_s25, [#allocation6], %s845_s13, %s845_s13, %s846_s14  }
  0x15   :  { %s747_s19 = scalar_lea.hbm %s980_s0, 256 }
  0x16   :  { %p748_p8 = scmp.ne.s32.totalorder %s980_s0, %s747_s19  ;;  %p751_p9 = scmp.lt.u32.totalorder %s747_s19, %s980_s0 }
  0x18   :  { %p753_p10 = pnand %p751_p9, %p748_p8 }
  0x1a   :  { %756 = shalt.err (!%p753_p10)
}
  0x1b   :  { %s757_s24 = scalar_lea.vmem %s895_s27, 256  ;;  %p762_p12 = scmp.lt.s32.totalorder %s895_s27, %s895_s27 }
  0x1c   :  { %p758_p11 = scmp.ne.s32.totalorder %s895_s27, %s757_s24  ;;  %p763_p13 = scmp.lt.s32.totalorder %s757_s24, %s757_s24 }
  0x1e   :  { %p764_p0 = por %p763_p13, %p762_p12 }
  0x20   :  { %p765_p1 = pnand %p764_p0, %p758_p11 }
  0x22   :  { %768 = shalt.err (!%p765_p1)
}
  0x23   :  { %27 = dma.hbm_to_vmem [thread:$0]  %s980_s0, 256, %s895_s27, [#allocation3], %s845_s13, %s845_s13, %s846_s14  }
  0x24   :  { %s847_s26 = smov [#allocation7]   ;;  %s769_s8 = scalar_lea.hbm %s983_s3, 2048 }
  0x25   :  { %s47_s28 = sshll.u32 %s847_s26, 4  ;;  %p770_p2 = scmp.ne.s32.totalorder %s983_s3, %s769_s8  ;;  %s48_s28 = int_to_ptr.vmem [resolvable:$true] %s47_s28 }
  0x26   :  { %p773_p3 = scmp.lt.u32.totalorder %s769_s8, %s983_s3 }
  0x28   :  { %p775_p4 = pnand %p773_p3, %p770_p2 }
  0x2a   :  { %778 = shalt.err (!%p775_p4)
}
  0x2b   :  { %s779_s15 = scalar_lea.vmem %s48_s28, 2048  ;;  %p784_p6 = scmp.lt.s32.totalorder %s48_s28, %s48_s28 }
  0x2c   :  { %p780_p5 = scmp.ne.s32.totalorder %s48_s28, %s779_s15  ;;  %p785_p7 = scmp.lt.s32.totalorder %s779_s15, %s779_s15 }
  0x2e   :  { %p786_p8 = por %p785_p7, %p784_p6 }
  0x30   :  { %p787_p9 = pnand %p786_p8, %p780_p5 }
  0x32   :  { %790 = shalt.err (!%p787_p9)
}
  0x33   :  { %s848_s0 = smov 64   ;;  %s849_s27 = smov 4  }
  0x34   :  { %53 = dma.hbm_to_vmem [thread:$0]  %s983_s3, 2048, %s48_s28, [#allocation6], %s848_s0, %s848_s0, %s849_s27  }
  0x35   :  { %s850_s16 = smov [#allocation8]   ;;  %s791_s20 = scalar_lea.hbm %s985_s5, 1024 }
  0x36   :  { %s61_s17 = sshll.u32 %s850_s16, 4  ;;  %p792_p10 = scmp.ne.s32.totalorder %s985_s5, %s791_s20  ;;  %s62_s17 = int_to_ptr.vmem [resolvable:$true] %s61_s17 }
  0x37   :  { %p795_p11 = scmp.lt.u32.totalorder %s791_s20, %s985_s5 }
  0x39   :  { %p797_p12 = pnand %p795_p11, %p792_p10 }
  0x3b   :  { %800 = shalt.err (!%p797_p12)
}
  0x3c   :  { %s801_s1 = scalar_lea.vmem %s62_s17, 1024  ;;  %p806_p0 = scmp.lt.s32.totalorder %s62_s17, %s62_s17 }
  0x3d   :  { %p802_p13 = scmp.ne.s32.totalorder %s62_s17, %s801_s1  ;;  %p807_p1 = scmp.lt.s32.totalorder %s801_s1, %s801_s1 }
  0x3f   :  { %p808_p2 = por %p807_p1, %p806_p0 }
  0x41   :  { %p809_p3 = pnand %p808_p2, %p802_p13 }
  0x43   :  { %812 = shalt.err (!%p809_p3)
}
  0x44   :  { %67 = dma.hbm_to_vmem [thread:$0]  %s985_s5, 1024, %s62_s17, [#allocation9], %s848_s0, %s848_s0, %s849_s27  }
  0x45   :  { %835 = dma.done.wait [#allocation3], 256  }
  0x46   :  { %836 = vsyncadd [#allocation3], 4294967040 }
  0x47   :  { %837 = dma.done.wait [#allocation6], 4096  }
  0x48   :  { %838 = vsyncadd [#allocation6], 4294963200 }
  0x49   :  { %839 = dma.done.wait [#allocation9], 1024  }
  0x4a   :  { %840 = vsyncadd [#allocation9], 4294966272  ;;  %v851_v0 = vmov 0   ;;  %v677_v1 = vld [vmem:[#allocation5 + $0x4] ss:$8 sps:$4 sm:$0xff]   ;;  %v705_v16 = vld [vmem:[#allocation7 + $0x50] sm:$0xff]   ;;  %v104_v42 = vlaneseq }
  0x4b   :  { %226 = vmatprep.mubr.bf16.mxu0 %v851_v0  ;;  %v679_v2 = vld [vmem:[#allocation5] ss:$8 sps:$4 sm:$0xff]   ;;  %194 = vmatprep.subr.bf16.mxu0 %v677_v1  ;;  %v680_v3 = vld [vmem:[#allocation5 + $0x14] ss:$8 sps:$4 sm:$0xff]   ;;  %v682_v4 = vld [vmem:[#allocation5 + $0x10] ss:$8 sps:$4 sm:$0xff]  }
  0x4c   :  { %195 = vmatpush1.bf16.msra.mxu0 %v679_v2  ;;  %v683_v5 = vld [vmem:[#allocation5 + $0x24] ss:$8 sps:$4 sm:$0xff]   ;;  %v685_v6 = vld [vmem:[#allocation5 + $0x20] ss:$8 sps:$4 sm:$0xff]   ;;  %v686_v7 = vld [vmem:[#allocation5 + $0x34] ss:$8 sps:$4 sm:$0xff]  }
  0x4d   :  { %196 = vmatprep.subr.bf16.mxu0 %v680_v3  ;;  %v688_v8 = vld [vmem:[#allocation5 + $0x30] ss:$8 sps:$4 sm:$0xff]   ;;  %v689_v9 = vld [vmem:[#allocation5 + $0x44] ss:$8 sps:$4 sm:$0xff]   ;;  %v691_v11 = vld [vmem:[#allocation5 + $0x40] ss:$8 sps:$4 sm:$0xff]  }
  0x4e   :  { %v701_v10 = vld [vmem:[#allocation7 + $0x40] sm:$0xff]   ;;  %v692_v13 = vld [vmem:[#allocation5 + $0x54] ss:$8 sps:$4 sm:$0xff]   ;;  %v703_v14 = vld [vmem:[#allocation7 + $0x48] sm:$0xff]   ;;  %v852_v37 = vmov 0.0   ;;  %v105_v43 = vshrl.u32 %v104_v42, 7 }
  0x4f   :  { %v702_v12 = vld [vmem:[#allocation7] sm:$0xff]   ;;  %614 = vmatprep.subr.bf16.mxu1 %v701_v10  ;;  %v704_v15 = vld [vmem:[#allocation7 + $0x8] sm:$0xff]   ;;  %v694_v17 = vld [vmem:[#allocation5 + $0x50] ss:$8 sps:$4 sm:$0xff]   ;;  %vm853_vm0 = vmmov 0   ;;  %s854_s8 = smov [#allocation10]  }
  0x50   :  { %197 = vmatpush1.bf16.msra.mxu0 %v682_v4  ;;  %615 = vmatpush3.bf16.msra.mxu1 %v702_v12  ;;  %v695_v18 = vld [vmem:[#allocation5 + $0x64] ss:$8 sps:$4 sm:$0xff]   ;;  %v706_v19 = vld [vmem:[#allocation7 + $0x10] sm:$0xff]   ;;  %v707_v20 = vld [vmem:[#allocation7 + $0x58] sm:$0xff]   ;;  %v106_v44 = vsub.s32 0, %v105_v43  ;;  %v110_v46 = vsub.s32 1, %v105_v43 }
  0x51   :  { %198 = vmatprep.subr.bf16.mxu0 %v683_v5  ;;  %616 = vmatprep.subr.bf16.mxu1 %v703_v14  ;;  %v697_v21 = vld [vmem:[#allocation5 + $0x60] ss:$8 sps:$4 sm:$0xff]   ;;  %v698_v22 = vld [vmem:[#allocation5 + $0x74] ss:$8 sps:$4 sm:$0xff]   ;;  %v700_v25 = vld [vmem:[#allocation5 + $0x70] ss:$8 sps:$4 sm:$0xff]  }
  0x52   :  { %v708_v23 = vld [vmem:[#allocation7 + $0x18] sm:$0xff]   ;;  %v709_v24 = vld [vmem:[#allocation7 + $0x60] sm:$0xff]   ;;  %v83_v26 = vld [vmem:[#allocation2] sm:$0xff] }
  0x53   :  { %v84_v27 = vld [vmem:[#allocation2 + $0x8] sm:$0xff]  ;;  %v710_v28 = vld [vmem:[#allocation7 + $0x20] sm:$0xff]   ;;  %v711_v29 = vld [vmem:[#allocation7 + $0x68] sm:$0xff]  }
  0x54   :  { %199 = vmatpush1.bf16.msra.mxu0 %v685_v6  ;;  %617 = vmatpush3.bf16.msra.mxu1 %v704_v15  ;;  %v85_v30 = vpack.c.bf16 %v84_v27, %v83_v26  ;;  %v712_v31 = vld [vmem:[#allocation7 + $0x28] sm:$0xff]   ;;  %v713_v32 = vld [vmem:[#allocation7 + $0x70] sm:$0xff]   ;;  %v715_v34 = vld [vmem:[#allocation7 + $0x78] sm:$0xff]  }
  0x55   :  { %200 = vmatprep.subr.bf16.mxu0 %v686_v7  ;;  %618 = vmatprep.subr.bf16.mxu1 %v705_v16  ;;  %v714_v33 = vld [vmem:[#allocation7 + $0x30] sm:$0xff]   ;;  %v716_v35 = vld [vmem:[#allocation7 + $0x38] sm:$0xff]   ;;  %v717_v36 = vld [vmem:[#allocation8] sm:$0xff]  }
  0x56   :  { %v718_v38 = vld [vmem:[#allocation8 + $0x8] sm:$0xff]   ;;  %v719_v39 = vld [vmem:[#allocation8 + $0x10] sm:$0xff]   ;;  %v720_v40 = vld [vmem:[#allocation8 + $0x18] sm:$0xff]  }
  0x57   :  { %v721_v41 = vld [vmem:[#allocation8 + $0x20] sm:$0xff]   ;;  %v102_v45 = vld [vmem:[%s982_s2] sm:$0x3]  ;;  %v722_v63 = vld [vmem:[#allocation8 + $0x28] sm:$0xff]  }
  0x58   :  { %201 = vmatpush1.bf16.msra.mxu0 %v688_v8  ;;  %619 = vmatpush3.bf16.msra.mxu1 %v706_v19  ;;  %v107_v47 = vrot.slane %v102_v45, %v106_v44  ;;  %v111_v48 = vrot.slane %v102_v45, %v110_v46  ;;  %v723_v0 = vld [vmem:[#allocation8 + $0x30] sm:$0xff]   ;;  %v724_v1 = vld [vmem:[#allocation8 + $0x38] sm:$0xff]  }
  0x59   :  { %202 = vmatprep.subr.bf16.mxu0 %v689_v9  ;;  %620 = vmatprep.subr.bf16.mxu1 %v707_v20  ;;  %v579_v3 = vld [vmem:[%s984_s4] ss:$0 sm:$0xff]  ;;  %s549_s4 = sshll.u32 %s854_s8, 4  ;;  %s550_s4 = int_to_ptr.vmem [resolvable:$true] %s549_s4 }
  0x5a   :  { %v596_v14 = vld [vmem:[%s986_s6] ss:$0 sm:$0xff]  ;;  %s813_s9 = scalar_lea.vmem %s550_s4, 128  ;;  %p818_p5 = scmp.lt.s32.totalorder %s550_s4, %s550_s4 }
  0x5b   :  { %p814_p4 = scmp.ne.s32.totalorder %s550_s4, %s813_s9  ;;  %p819_p6 = scmp.lt.s32.totalorder %s813_s9, %s813_s9 }
  0x5c   :  { %203 = vmatpush1.bf16.msra.mxu0 %v691_v11  ;;  %621 = vmatpush3.bf16.msra.mxu1 %v708_v23 }
  0x5d   :  { %204 = vmatprep.subr.bf16.mxu0 %v692_v13  ;;  %622 = vmatprep.subr.bf16.mxu1 %v709_v24  ;;  %p820_p7 = por %p819_p6, %p818_p5 }
  0x5f   :  { %p821_p8 = pnand %p820_p7, %p814_p4 }
  0x60   :  { %205 = vmatpush1.bf16.msra.mxu0 %v694_v17  ;;  %623 = vmatpush3.bf16.msra.mxu1 %v710_v28 }
  0x61   :  { %206 = vmatprep.subr.bf16.mxu0 %v695_v18  ;;  %624 = vmatprep.subr.bf16.mxu1 %v711_v29 }
  0x64   :  { %207 = vmatpush1.bf16.msra.mxu0 %v697_v21  ;;  %625 = vmatpush3.bf16.msra.mxu1 %v712_v31 }
  0x65   :  { %208 = vmatprep.subr.bf16.mxu0 %v698_v22  ;;  %626 = vmatprep.subr.bf16.mxu1 %v713_v32 }
  0x68   :  { %209 = vmatpush1.bf16.msra.mxu0 %v700_v25  ;;  %627 = vmatpush3.bf16.msra.mxu1 %v714_v33 }
  0x69   :  { %628 = vmatprep.subr.bf16.mxu1 %v715_v34  ;;  %645 = vmatprep.subr.bf16.mxu0 %v852_v37 }
  0x6b   :  { %227 = vmatmul.mubr.bf16.vlgmr.msra.gmra.mrb[0].mxu0 %v85_v30 }
  0x6c   :  { %629 = vmatpush3.bf16.msra.mxu1 %v716_v35  ;;  %646 = vmatpush3.bf16.msra.mxu0 %v717_v36 }
  0x6d   :  { %647 = vmatprep.subr.bf16.mxu0 %v852_v37  ;;  %661 = vmatprep.mubr.msk.bf16.mxu0 %vm853_vm0, %v852_v37 }
  0x70   :  { %648 = vmatpush3.bf16.msra.mxu0 %v718_v38 }
  0x71   :  { %649 = vmatprep.subr.bf16.mxu0 %v852_v37 }
  0x74   :  { %650 = vmatpush3.bf16.msra.mxu0 %v719_v39 }
  0x75   :  { %651 = vmatprep.subr.bf16.mxu0 %v852_v37 }
  0x78   :  { %652 = vmatpush3.bf16.msra.mxu0 %v720_v40 }
  0x79   :  { %653 = vmatprep.subr.bf16.mxu0 %v852_v37 }
  0x7c   :  { %654 = vmatpush3.bf16.msra.mxu0 %v721_v41 }
  0x7d   :  { %655 = vmatprep.subr.bf16.mxu0 %v852_v37 }
  0x80   :  { %656 = vmatpush3.bf16.msra.mxu0 %v722_v63 }
  0x81   :  { %657 = vmatprep.subr.bf16.mxu0 %v852_v37 }
  0x84   :  { %658 = vmatpush3.bf16.msra.mxu0 %v723_v0 }
  0x85   :  { %659 = vmatprep.subr.bf16.mxu0 %v852_v37 }
  0x88   :  { %660 = vmatpush3.bf16.msra.mxu0 %v724_v1 }
 0x13e   :  { %v228_v49 = vpop.f32.mrb[0].mxu0 }
 0x13f   :  { %v229_v50 = vadd.f32 %v228_v49, %v107_v47  ;;  %v230_v51 = vpop.f32.mrb[1].mxu0 }
 0x140   :  { %v231_v52 = vadd.f32 %v230_v51, %v111_v48  ;;  %v232_v53 = vpop.f32.mrb[2].mxu0 }
 0x141   :  { %v233_v54 = vadd.f32 %v232_v53, %v107_v47  ;;  %v234_v55 = vpop.f32.mrb[3].mxu0  ;;  %v237_v57 = vmax.f32 %v229_v50, 0.0 }
 0x142   :  { %v235_v56 = vadd.f32 %v234_v55, %v111_v48  ;;  %v238_v59 = vmax.f32 %v231_v52, 0.0 }
 0x143   :  { %v239_v58 = vmax.f32 %v233_v54, 0.0 }
 0x144   :  { %v240_v60 = vmax.f32 %v235_v56, 0.0 }
 0x145   :  { %v241_v61 = vpack.c.bf16 %v239_v58, %v237_v57 }
 0x146   :  { %v242_v62 = vpack.c.bf16 %v240_v60, %v238_v59 }
 0x148   :  { %410 = vmatprep.mubr.bf16.mxu1 %v242_v62 }
 0x149   :  { %411 = vmatmul.mubr.bf16.vlgmr.msra.gmra.mrb[0].mxu1 %v241_v61 }
 0x21c   :  { %v630_v2 = vpop.f32.mrb[0].mxu1 }
 0x21d   :  { %v631_v4 = vpop.f32.mrb[1].mxu1 }
 0x21e   :  { %v632_v5 = vadd.f32 %v631_v4, %v630_v2  ;;  %v633_v6 = vpop.f32.mrb[2].mxu1 }
 0x21f   :  { %v634_v7 = vpop.f32.mrb[3].mxu1 }
 0x220   :  { %v413_v8 = vadd.f32 %v632_v5, %v579_v3  ;;  %v635_v9 = vadd.f32 %v634_v7, %v633_v6 }
 0x222   :  { %v416_v10 = vadd.f32 %v635_v9, %v579_v3  ;;  %v419_v11 = vmax.f32 %v413_v8, 0.0 }
 0x224   :  { %v420_v12 = vmax.f32 %v416_v10, 0.0 }
 0x226   :  { %v421_v13 = vpack.c.bf16 %v420_v12, %v419_v11 }
 0x228   :  { %662 = vmatmul.mubr.bf16.vlgmr.msra.gmra.mrb[4].mxu0 %v421_v13 }
 0x2fb   :  { %v527_v15 = vpop.f32.mrb[4].mxu0 }
 0x2fc   :  { %v663_v16 = vpop.f32.mrb[5].mxu0  ;;  %v528_v18 = vadd.f32 %v596_v14, %v527_v15 }
 0x2fd   :  { %v530_v17 = vpop.f32.mrb[6].mxu0 }
 0x2fe   :  { %v531_v19 = vadd.f32 %v596_v14, %v530_v17  ;;  %v664_v20 = vpop.f32.mrb[7].mxu0 }
 0x300   :  { %v612_v21 = vpack.c.bf16 %v531_v19, %v528_v18 }
 0x302   :  { %613 = vst [vmem:[#allocation10] sm:$0xff] %v612_v21  }
 0x303   :  { %824 = shalt.err (!%p821_p8)
}
 0x304   :  { %s825_s11 = scalar_lea.hbm %s987_s7, 128 }
 0x305   :  { %p826_p9 = scmp.ne.s32.totalorder %s987_s7, %s825_s11  ;;  %p829_p10 = scmp.lt.u32.totalorder %s825_s11, %s987_s7 }
 0x307   :  { %p831_p11 = pnand %p829_p10, %p826_p9 }
 0x309   :  { %834 = shalt.err (!%p831_p11)
}
 0x30a   :  { %555 = dma.vmem_to_hbm [thread:$0]  %s550_s4, 128, %s987_s7, [#allocation4], %s848_s0, %s848_s0, %s849_s27  }
 0x30b   :  { %841 = dma.done.wait [#allocation4], 128  }
 0x30c   :  { %842 = vsyncadd [#allocation4], 4294967168 }
 0x30d   :  { %559 = vsyncpa [#allocation3], 1 }
 0x30e   :  { %560 = vsyncpa [#allocation6], 1 }
 0x30f   :  { %561 = vsyncpa [#allocation9], 1 }
 0x310   :  { %562 = vsyncpa [#allocation4], 1 }

</bundles_post_ra>
